<compile_context>
chip_gen: v5e
topology: v5e:2x2
jax: 0.10.0
libtpu: 0.0.40
codegen_flags: <defaults>
</compile_context>

<pallas_src>
import jax
import jax.numpy as jnp
from jax import lax
from jax.experimental import pallas as pl
from jax.experimental.pallas import tpu as pltpu

EPS = 1e-5  # nn.BatchNorm2d default eps


def skip_dw_kernel(x_ref, p_ref, o_ref):
    """Fused forward of SkipConnectionDepthwise.

    x_ref : (N, Cin, HW)          f32  NCHW activations, H*W flattened (lane-dense)
    p_ref : (Cmax, Cin + 5)       f32  packed parameters, Cmax = max(Cin, Cout):
              cols [0:Cin]   rows[0:Cout] : w2   pointwise 1x1 conv weight
              col  Cin       rows[0:Cin]  : w1   depthwise per-channel scale
              col  Cin+1/+2  rows[0:Cin]  : BN1 gamma / beta
              col  Cin+3/+4  rows[0:Cout] : BN2 gamma / beta
    o_ref : (N, Cout, HW)         f32
    """
    N, Cin, HW = x_ref.shape
    Cout = o_ref.shape[1]
    M = N * HW
    inv_m = 1.0 / float(M)  # static

    # ---- single parameter load, sliced in registers (one DMA for all params)
    p = p_ref[...]                              # (Cmax, Cin+5)
    w2 = p[0:Cout, 0:Cin]                       # (Cout, Cin)
    w1 = p[0:Cin, Cin:Cin + 1]                  # (Cin, 1)
    g1 = p[0:Cin, Cin + 1:Cin + 2]              # (Cin, 1)
    b1 = p[0:Cin, Cin + 2:Cin + 3]              # (Cin, 1)
    g2 = p[0:Cout, Cin + 3:Cin + 4]             # (Cout, 1)
    b2 = p[0:Cout, Cin + 4:Cin + 5]             # (Cout, 1)

    # ---- whole batch as one lane-dense slab: (Cin, N*HW), lanes = 512 -------
    x = jnp.concatenate([x_ref[n] for n in range(N)], axis=-1)

    # ---- Stage 1: depthwise 1x1 conv + BN1 (batch stats) + ReLU -------------
    # Single-pass stats (sum, sum-of-squares): 2 lane reductions total.
    s1 = jnp.sum(x, axis=-1, keepdims=True)                   # (Cin, 1)
    s2 = jnp.sum(x * x, axis=-1, keepdims=True)               # (Cin, 1)
    mean_x = s1 * inv_m
    var_x = jnp.maximum(s2 * inv_m - mean_x * mean_x, 0.0)    # biased (train mode)

    # y = w1 * x  =>  E[y] = w1*E[x], Var[y] = w1^2 * Var[x]; fold conv scale,
    # BN normalization and BN affine into one per-channel FMA, then ReLU.
    inv_std1 = lax.rsqrt(w1 * w1 * var_x + EPS)               # (Cin, 1)
    a1 = w1 * g1 * inv_std1
    c1 = b1 - w1 * mean_x * g1 * inv_std1
    z = jnp.maximum(x * a1 + c1, 0.0)                         # (Cin, N*HW)

    # ---- Stage 2: pointwise 1x1 conv (single MXU matmul) + BN2 + ReLU -------
    u = jnp.dot(w2, z, preferred_element_type=jnp.float32)    # (Cout, N*HW)

    t1 = jnp.sum(u, axis=-1, keepdims=True)                   # (Cout, 1)
    t2 = jnp.sum(u * u, axis=-1, keepdims=True)               # (Cout, 1)
    mean_u = t1 * inv_m
    var_u = jnp.maximum(t2 * inv_m - mean_u * mean_u, 0.0)
    inv_std2 = lax.rsqrt(var_u + EPS)
    a2 = g2 * inv_std2                                        # (Cout, 1)
    c2 = b2 - mean_u * a2

    y = jnp.maximum(u * a2 + c2, 0.0)                         # one (Cout, N*HW) FMA+ReLU

    # Dense 256-lane stores, one per sample (static slices of 128-multiples).
    for n in range(N):
        o_ref[n] = y[:, n * HW:(n + 1) * HW]


def skip_connection_depthwise_forward(x_nchw, w1_dw, gamma1, beta1,
                                      w2_pw, gamma2, beta2):
    """SkipConnectionDepthwise.forward. Accepts/returns PyTorch NCHW layout."""
    N, Cin, H, W = x_nchw.shape
    Cout = w2_pw.shape[0]
    HW = H * W
    Cmax = max(Cin, Cout)

    # NCHW-native: collapsing (H, W) -> HW is a free row-major reshape; no
    # wrapper-side transposes or pads, and none after the kernel.
    # (If upstream activations are bf16 in the real model, pass them through
    #  in bf16 and cast inside the kernel to halve the HBM->VMEM traffic.)
    x3 = x_nchw.astype(jnp.float32).reshape(N, Cin, HW)

    # Pack ALL parameters into one tiny slab -> one DMA instead of six.
    p = jnp.zeros((Cmax, Cin + 5), jnp.float32)
    p = p.at[:Cout, 0:Cin].set(w2_pw.reshape(Cout, Cin).astype(jnp.float32))
    p = p.at[:Cin, Cin].set(w1_dw.reshape(Cin).astype(jnp.float32))
    p = p.at[:Cin, Cin + 1].set(gamma1.astype(jnp.float32))
    p = p.at[:Cin, Cin + 2].set(beta1.astype(jnp.float32))
    p = p.at[:Cout, Cin + 3].set(gamma2.astype(jnp.float32))
    p = p.at[:Cout, Cin + 4].set(beta2.astype(jnp.float32))

    # Advisory cost so XLA can overlap this tiny custom call with neighbours.
    m = N * HW
    cost = pl.CostEstimate(
        flops=2 * Cout * Cin * m + 6 * m * (Cin + Cout),
        transcendentals=Cin + Cout,
        bytes_accessed=4 * (x3.size + N * Cout * HW + p.size),
    )

    vmem = pl.BlockSpec(memory_space=pltpu.MemorySpace.VMEM)
    out3 = pl.pallas_call(
        skip_dw_kernel,
        out_shape=jax.ShapeDtypeStruct((N, Cout, HW), jnp.float32),
        in_specs=[vmem, vmem],
        out_specs=vmem,
        cost_estimate=cost,
    )(x3, p)
    return out3.reshape(N, Cout, H, W)


def reference_forward(x, w1_dw, gamma1, beta1, w2_pw, gamma2, beta2):
    """Pure-JAX reference mirroring the PyTorch module, for verification."""
    x = x.astype(jnp.float32)
    Cin = x.shape[1]
    Cout = w2_pw.shape[0]

    # Depthwise 1x1 conv (groups=Cin, bias=False) == per-channel scale.
    y = x * w1_dw.reshape(1, Cin, 1, 1)
    m1 = jnp.mean(y, axis=(0, 2, 3), keepdims=True)
    v1 = jnp.mean((y - m1) ** 2, axis=(0, 2, 3), keepdims=True)
    y = (y - m1) * lax.rsqrt(v1 + EPS) * gamma1.reshape(1, Cin, 1, 1) \
        + beta1.reshape(1, Cin, 1, 1)
    y = jnp.maximum(y, 0.0)

    # Pointwise 1x1 conv (bias=False).
    u = jnp.einsum('nchw,oc->nohw', y, w2_pw.reshape(Cout, Cin))
    m2 = jnp.mean(u, axis=(0, 2, 3), keepdims=True)
    v2 = jnp.mean((u - m2) ** 2, axis=(0, 2, 3), keepdims=True)
    u = (u - m2) * lax.rsqrt(v2 + EPS) * gamma2.reshape(1, Cout, 1, 1) \
        + beta2.reshape(1, Cout, 1, 1)
    return jnp.maximum(u, 0.0)


if __name__ == "__main__":
    # Small shapes consistent with the module: batch=2, input_channels=4,
    # spatial=16x16, out_channels=8.
    N, Cin, H, W = 2, 4, 16, 16
    Cout = 8

    key = jax.random.PRNGKey(0)
    kx, k1, kg1, kb1, k2, kg2, kb2 = jax.random.split(key, 7)

    x = jax.random.normal(kx, (N, Cin, H, W), dtype=jnp.float32)

    # Deterministic PyTorch-style inits.
    # depthwise conv: weight (Cin, 1, 1, 1), fan_in = 1 -> bound 1.0
    w1 = jax.random.uniform(k1, (Cin, 1, 1, 1), minval=-1.0, maxval=1.0,
                            dtype=jnp.float32)
    # pointwise conv: weight (Cout, Cin, 1, 1), fan_in = Cin = 4 -> bound 0.5
    w2 = jax.random.uniform(k2, (Cout, Cin, 1, 1), minval=-0.5, maxval=0.5,
                            dtype=jnp.float32)
    gamma1 = jax.random.uniform(kg1, (Cin,), minval=0.8, maxval=1.2,
                                dtype=jnp.float32)
    beta1 = jax.random.uniform(kb1, (Cin,), minval=-0.1, maxval=0.1,
                               dtype=jnp.float32)
    gamma2 = jax.random.uniform(kg2, (Cout,), minval=0.8, maxval=1.2,
                                dtype=jnp.float32)
    beta2 = jax.random.uniform(kb2, (Cout,), minval=-0.1, maxval=0.1,
                               dtype=jnp.float32)

    fwd = jax.jit(skip_connection_depthwise_forward)
    out = jax.block_until_ready(fwd(x, w1, gamma1, beta1, w2, gamma2, beta2))
    ref = jax.block_until_ready(
        reference_forward(x, w1, gamma1, beta1, w2, gamma2, beta2))

    assert out.shape == (N, Cout, H, W), out.shape
    max_err = float(jnp.max(jnp.abs(out - ref)))
    assert jnp.allclose(out, ref, atol=1e-4, rtol=1e-4), max_err

    print("KERNEL_OK")
</pallas_src>

<mosaic_0001>
module attributes {stable_mosaic.version = 11 : i64} {
  func.func @skip_dw_kernel(%arg0: memref<2x4x256xf32, #tpu.memory_space<vmem>>, %arg1: memref<8x9xf32, #tpu.memory_space<vmem>>, %arg2: memref<2x8x256xf32, #tpu.memory_space<vmem>>) attributes {dimension_semantics = [], scalar_prefetch = 0 : i64, scratch_operands = 0 : i64, tpu.core_type = #tpu.core_type<tc>} {
    %c0 = arith.constant 0 : index
    %c0_0 = arith.constant 0 : index
    %0 = vector.load %arg1[%c0, %c0_0] : memref<8x9xf32, #tpu.memory_space<vmem>>, vector<8x9xf32>
    %1 = vector.extract_strided_slice %0 {offsets = [0, 0], sizes = [8, 4], strides = [1, 1]} : vector<8x9xf32> to vector<8x4xf32>
    %2 = vector.extract_strided_slice %0 {offsets = [0, 4], sizes = [4, 1], strides = [1, 1]} : vector<8x9xf32> to vector<4x1xf32>
    %3 = vector.extract_strided_slice %0 {offsets = [0, 5], sizes = [4, 1], strides = [1, 1]} : vector<8x9xf32> to vector<4x1xf32>
    %4 = vector.extract_strided_slice %0 {offsets = [0, 6], sizes = [4, 1], strides = [1, 1]} : vector<8x9xf32> to vector<4x1xf32>
    %5 = vector.extract_strided_slice %0 {offsets = [0, 7], sizes = [8, 1], strides = [1, 1]} : vector<8x9xf32> to vector<8x1xf32>
    %6 = vector.extract_strided_slice %0 {offsets = [0, 8], sizes = [8, 1], strides = [1, 1]} : vector<8x9xf32> to vector<8x1xf32>
    %c0_1 = arith.constant 0 : index
    %c0_2 = arith.constant 0 : index
    %c0_3 = arith.constant 0 : index
    %7 = vector.load %arg0[%c0_1, %c0_2, %c0_3] : memref<2x4x256xf32, #tpu.memory_space<vmem>>, vector<1x4x256xf32>
    %8 = vector.shape_cast %7 : vector<1x4x256xf32> to vector<4x256xf32>
    %c1 = arith.constant 1 : index
    %c0_4 = arith.constant 0 : index
    %c0_5 = arith.constant 0 : index
    %9 = vector.load %arg0[%c1, %c0_4, %c0_5] : memref<2x4x256xf32, #tpu.memory_space<vmem>>, vector<1x4x256xf32>
    %10 = vector.shape_cast %9 : vector<1x4x256xf32> to vector<4x256xf32>
    %11 = tpu.concatenate %8, %10 in 1 : vector<4x256xf32>, vector<4x256xf32> -> vector<4x512xf32>
    %cst = arith.constant dense<0.000000e+00> : vector<4xf32>
    %12 = vector.multi_reduction <add>, %11, %cst [1] : vector<4x512xf32> to vector<4xf32>
    %13 = vector.shape_cast %12 : vector<4xf32> to vector<4x1xf32>
    %14 = arith.mulf %11, %11 : vector<4x512xf32>
    %cst_6 = arith.constant dense<0.000000e+00> : vector<4xf32>
    %15 = vector.multi_reduction <add>, %14, %cst_6 [1] : vector<4x512xf32> to vector<4xf32>
    %16 = vector.shape_cast %15 : vector<4xf32> to vector<4x1xf32>
    %cst_7 = arith.constant 0.001953125 : f32
    %17 = vector.broadcast %cst_7 : f32 to vector<4x1xf32>
    %18 = arith.mulf %13, %17 : vector<4x1xf32>
    %cst_8 = arith.constant 0.001953125 : f32
    %19 = vector.broadcast %cst_8 : f32 to vector<4x1xf32>
    %20 = arith.mulf %16, %19 : vector<4x1xf32>
    %21 = arith.mulf %18, %18 : vector<4x1xf32>
    %22 = arith.subf %20, %21 : vector<4x1xf32>
    %cst_9 = arith.constant 0.000000e+00 : f32
    %23 = vector.broadcast %cst_9 : f32 to vector<4x1xf32>
    %24 = arith.maximumf %22, %23 : vector<4x1xf32>
    %25 = arith.mulf %2, %2 : vector<4x1xf32>
    %26 = arith.mulf %25, %24 : vector<4x1xf32>
    %cst_10 = arith.constant 9.99999974E-6 : f32
    %27 = vector.broadcast %cst_10 : f32 to vector<4x1xf32>
    %28 = arith.addf %26, %27 : vector<4x1xf32>
    %29 = math.rsqrt %28 : vector<4x1xf32>
    %30 = arith.mulf %2, %3 : vector<4x1xf32>
    %31 = arith.mulf %30, %29 : vector<4x1xf32>
    %32 = arith.mulf %2, %18 : vector<4x1xf32>
    %33 = arith.mulf %32, %3 : vector<4x1xf32>
    %34 = arith.mulf %33, %29 : vector<4x1xf32>
    %35 = arith.subf %4, %34 : vector<4x1xf32>
    %36 = vector.broadcast %31 : vector<4x1xf32> to vector<4x512xf32>
    %37 = arith.mulf %11, %36 : vector<4x512xf32>
    %38 = vector.broadcast %35 : vector<4x1xf32> to vector<4x512xf32>
    %39 = arith.addf %37, %38 : vector<4x512xf32>
    %cst_11 = arith.constant 0.000000e+00 : f32
    %40 = vector.broadcast %cst_11 : f32 to vector<4x512xf32>
    %41 = arith.maximumf %39, %40 : vector<4x512xf32>
    %cst_12 = arith.constant dense<0.000000e+00> : vector<8x512xf32>
    %42 = tpu.matmul %1, %41, %cst_12 {dimension_numbers = #tpu.dot_dimension_numbers<[1], [0], [0], [1], [0, 0, 1, 1], [], []>} : vector<8x4xf32>, vector<4x512xf32>, vector<8x512xf32> -> vector<8x512xf32>
    %cst_13 = arith.constant dense<0.000000e+00> : vector<8xf32>
    %43 = vector.multi_reduction <add>, %42, %cst_13 [1] : vector<8x512xf32> to vector<8xf32>
    %44 = vector.shape_cast %43 : vector<8xf32> to vector<8x1xf32>
    %45 = arith.mulf %42, %42 : vector<8x512xf32>
    %cst_14 = arith.constant dense<0.000000e+00> : vector<8xf32>
    %46 = vector.multi_reduction <add>, %45, %cst_14 [1] : vector<8x512xf32> to vector<8xf32>
    %47 = vector.shape_cast %46 : vector<8xf32> to vector<8x1xf32>
    %cst_15 = arith.constant 0.001953125 : f32
    %48 = vector.broadcast %cst_15 : f32 to vector<8x1xf32>
    %49 = arith.mulf %44, %48 : vector<8x1xf32>
    %cst_16 = arith.constant 0.001953125 : f32
    %50 = vector.broadcast %cst_16 : f32 to vector<8x1xf32>
    %51 = arith.mulf %47, %50 : vector<8x1xf32>
    %52 = arith.mulf %49, %49 : vector<8x1xf32>
    %53 = arith.subf %51, %52 : vector<8x1xf32>
    %cst_17 = arith.constant 0.000000e+00 : f32
    %54 = vector.broadcast %cst_17 : f32 to vector<8x1xf32>
    %55 = arith.maximumf %53, %54 : vector<8x1xf32>
    %cst_18 = arith.constant 9.99999974E-6 : f32
    %56 = vector.broadcast %cst_18 : f32 to vector<8x1xf32>
    %57 = arith.addf %55, %56 : vector<8x1xf32>
    %58 = math.rsqrt %57 : vector<8x1xf32>
    %59 = arith.mulf %5, %58 : vector<8x1xf32>
    %60 = arith.mulf %49, %59 : vector<8x1xf32>
    %61 = arith.subf %6, %60 : vector<8x1xf32>
    %62 = vector.broadcast %59 : vector<8x1xf32> to vector<8x512xf32>
    %63 = arith.mulf %42, %62 : vector<8x512xf32>
    %64 = vector.broadcast %61 : vector<8x1xf32> to vector<8x512xf32>
    %65 = arith.addf %63, %64 : vector<8x512xf32>
    %cst_19 = arith.constant 0.000000e+00 : f32
    %66 = vector.broadcast %cst_19 : f32 to vector<8x512xf32>
    %67 = arith.maximumf %65, %66 : vector<8x512xf32>
    %68 = vector.extract_strided_slice %67 {offsets = [0, 0], sizes = [8, 256], strides = [1, 1]} : vector<8x512xf32> to vector<8x256xf32>
    %c0_20 = arith.constant 0 : index
    %c0_21 = arith.constant 0 : index
    %c0_22 = arith.constant 0 : index
    %69 = vector.load %arg2[%c0_20, %c0_21, %c0_22] : memref<2x8x256xf32, #tpu.memory_space<vmem>>, vector<1x8x256xf32>
    %70 = vector.shape_cast %69 : vector<1x8x256xf32> to vector<8x256xf32>
    %71 = vector.shape_cast %68 : vector<8x256xf32> to vector<1x8x256xf32>
    tpu.vector_store %arg2[%c0_20, %c0_21, %c0_22], %71 {strides = array<i32>} : memref<2x8x256xf32, #tpu.memory_space<vmem>>, vector<1x8x256xf32>,
    %72 = vector.extract_strided_slice %67 {offsets = [0, 256], sizes = [8, 256], strides = [1, 1]} : vector<8x512xf32> to vector<8x256xf32>
    %c1_23 = arith.constant 1 : index
    %c0_24 = arith.constant 0 : index
    %c0_25 = arith.constant 0 : index
    %73 = vector.load %arg2[%c1_23, %c0_24, %c0_25] : memref<2x8x256xf32, #tpu.memory_space<vmem>>, vector<1x8x256xf32>
    %74 = vector.shape_cast %73 : vector<1x8x256xf32> to vector<8x256xf32>
    %75 = vector.shape_cast %72 : vector<8x256xf32> to vector<1x8x256xf32>
    tpu.vector_store %arg2[%c1_23, %c0_24, %c0_25], %75 {strides = array<i32>} : memref<2x8x256xf32, #tpu.memory_space<vmem>>, vector<1x8x256xf32>,
    return
  }
}

</mosaic_0001>

<bundles_post_ra>
// kernel: skip_connection_depthwise_forward.1
= control target key start
LH: loop header
LB: loop body
LE: loop exit
PB: predicated region body
PF: predicated region fallthrough
CT: control target
= control target key end

     0   :  { %s294_s13 = smov 127   ;;  %vm27_vm0 = vcmask 1043456   ;;  %v295_v25 = vmov 4   ;;  %v297_v49 = vmov 6   ;;  %vm104_vm4 = vcmask 31744   ;;  %s375_s0 = inlined_call_operand.vmem [shape: f32[2,4,256], index: 0, kind: input, shape index: {}]   ;;  %s376_s1 = inlined_call_operand.vmem [shape: f32[8,9], index: 1, kind: input, shape index: {}]   ;;  %s377_s2 = inlined_call_operand.vmem [shape: f32[2,8,256], index: 2, kind: output, shape index: {}]  }
   0x1   :  { %v12_v0 = vld [vmem:[%s375_s0] sm:$0xff]  ;;  %v267_v2 = vld [vmem:[%s375_s0 + $0x8] sm:$0xff]  ;;  %285 = vset.pattern.permute.xlu2 %v295_v25  ;;  %s296_s0 = smov 2  }
   0x2   :  { %v322_v1 = vld [vmem:[%s376_s1] sm:$0xff]  ;;  %16 = vst [vmem:[#allocation1] ss:$2 sm:$0xff] %v12_v0  ;;  %s299_s1 = smov 1  }
   0x3   :  { %69 = vrot.lane.b32.xlu1 %v322_v1, %s294_s13  ;;  %v55_v31 = vmul.f32 %v322_v1, %v322_v1 }
   0x9   :  { %v328_v3 = vld.sshfl [vmem:[#allocation1] sm:$0xff pattern:$0x75316420]  ;;  %v330_v4 = vld.sshfl [vmem:[#allocation1 + $0x8] sm:$0xff pattern:$0x75316420] }
   0xa   :  { %22 = vst [vmem:[#allocation1] ss:$2 sm:$0xff] %v267_v2  ;;  %v28_v5 = vsel %vm27_vm0, %v328_v3, 0.0  ;;  %v29_v6 = vsel %vm27_vm0, %v330_v4, 0.0  ;;  %v37_v7 = vmul.f32 %v328_v3, %v328_v3  ;;  %v38_v8 = vmul.f32 %v330_v4, %v330_v4 }
   0xb   :  { %v30_v9 = vadd.f32 %v29_v6, %v28_v5 }
   0xc   :  { %v41_v10 = vsel %vm27_vm0, %v37_v7, 0.0  ;;  %v42_v11 = vsel %vm27_vm0, %v38_v8, 0.0 }
   0xd   :  { %v43_v18 = vadd.f32 %v42_v11, %v41_v10 }
  0x11   :  { %v23_v12 = vld.sshfl [vmem:[#allocation1] sm:$0xff pattern:$0x75316420]  ;;  %v24_v13 = vld.sshfl [vmem:[#allocation1 + $0x8] sm:$0xff pattern:$0x75316420] }
  0x12   :  { %v31_v14 = vsel %vm27_vm0, %v23_v12, 0.0  ;;  %v33_v15 = vsel %vm27_vm0, %v24_v13, 0.0  ;;  %v39_v16 = vmul.f32 %v23_v12, %v23_v12  ;;  %v40_v19 = vmul.f32 %v24_v13, %v24_v13 }
  0x13   :  { %v32_v17 = vadd.f32 %v31_v14, %v30_v9 }
  0x14   :  { %v44_v20 = vsel %vm27_vm0, %v39_v16, 0.0  ;;  %v46_v23 = vsel %vm27_vm0, %v40_v19, 0.0 }
  0x15   :  { %v34_v21 = vadd.f32 %v33_v15, %v32_v17  ;;  %v45_v22 = vadd.f32 %v44_v20, %v43_v18  ;;  %v298_v17 = vmov 7  }
  0x16   :  { %287 = vset.pattern.permute.xlu0 %v298_v17 }
  0x17   :  { %35 = vadd.xlane.f32.xlu0 %v34_v21  ;;  %v47_v24 = vadd.f32 %v46_v23, %v45_v22 }
  0x1f   :  { %48 = vadd.xlane.f32.xlu0 %v47_v24 }
  0x75   :  { %v70_v41 = vpop.permute.xlu1 %69 }
  0x76   :  { %v72_v43 = vmul.f32 %v70_v41, %v322_v1 }
  0x8a   :  { %v36_v26 = vpop.xlane.xlu0 %35 }
  0x8b   :  { %v50_v27 = vmul.f32 0.001953125, %v36_v26 }
  0x8d   :  { %v52_v29 = vmul.f32 %v50_v27, %v50_v27  ;;  %v74_v40 = vmul.f32 %v50_v27, %v322_v1 }
  0x8f   :  { %v75_v45 = vmul.f32 %v74_v40, %v70_v41 }
  0x92   :  { %v49_v28 = vpop.xlane.xlu0 %48 }
  0x93   :  { %v51_v30 = vmul.f32 0.001953125, %v49_v28 }
  0x95   :  { %v53_v32 = vsub.f32 %v51_v30, %v52_v29 }
  0x97   :  { %v54_v33 = vmax.f32 %v53_v32, 0.0 }
  0x99   :  { %v56_v34 = vmul.f32 %v55_v31, %v54_v33 }
  0x9b   :  { %v57_v35 = vadd.f32 1e-05, %v56_v34 }
  0x9d   :  { %290 = vrsqrt.f32 %v57_v35  ;;  %vm64_vm2 = vweird.f32 %v57_v35 }
  0xa3   :  { %v291_v36 = vpop.eup %290 }
  0xa4   :  { %v59_v37 = vmul.f32 %v291_v36, %v57_v35  ;;  %vm65_vm1 = vweird.f32 %v291_v36  ;;  %v300_v35 = vmov 8  }
  0xa5   :  { %vm66_vm3 = vmor %vm64_vm2, %vm65_vm1 }
  0xa6   :  { %v60_v38 = vmul.f32 %v291_v36, %v59_v37 }
  0xa8   :  { %v61_v39 = vmul.f32 0.5, %v60_v38 }
  0xaa   :  { %v62_v42 = vsub.f32 1.5, %v61_v39 }
  0xac   :  { %v63_v44 = vmul.f32 %v291_v36, %v62_v42 }
  0xae   :  { %v67_v46 = vsel %vm66_vm3, %v291_v36, %v63_v44 }
  0xaf   :  { %v76_v47 = vmul.f32 %v75_v45, %v67_v46  ;;  %v73_v48 = vmul.f32 %v72_v43, %v67_v46 }
  0xb1   :  { %78 = vrot.lane.b32.xlu1 %v76_v47, %s296_s0  ;;  %84 = vperm.xlu2 %285, %v73_v48  }
  0xb9   :  { %286 = vset.pattern.permute.xlu2 %v297_v49 }
 0x10b   :  { %v85_v52 = vpop.permute.xlu2 %84 }
 0x10c   :  { %v87_v53 = vmul.f32 %v85_v52, %v328_v3  ;;  %v88_v54 = vmul.f32 %v85_v52, %v330_v4  ;;  %v89_v55 = vmul.f32 %v85_v52, %v23_v12  ;;  %v90_v56 = vmul.f32 %v85_v52, %v24_v13 }
 0x123   :  { %v79_v50 = vpop.permute.xlu1 %78 }
 0x124   :  { %v81_v51 = vsub.f32 %v322_v1, %v79_v50 }
 0x126   :  { %93 = vperm.xlu2 %286, %v81_v51  }
 0x12e   :  { %288 = vset.pattern.permute.xlu2 %v300_v35 }
 0x180   :  { %v94_v57 = vpop.permute.xlu2 %93 }
 0x181   :  { %v96_v58 = vadd.f32 %v94_v57, %v87_v53  ;;  %v97_v59 = vadd.f32 %v94_v57, %v88_v54  ;;  %v98_v60 = vadd.f32 %v94_v57, %v89_v55  ;;  %v99_v61 = vadd.f32 %v94_v57, %v90_v56 }
 0x183   :  { %v100_v62 = vmax.f32 %v96_v58, 0.0  ;;  %v101_v63 = vmax.f32 %v97_v59, 0.0  ;;  %v102_v0 = vmax.f32 %v98_v60, 0.0  ;;  %v103_v2 = vmax.f32 %v99_v61, 0.0 }
 0x185   :  { %268 = vmatpush.msk.msra.mxu0 %vm27_vm0, %v100_v62  ;;  %270 = vmatpush.msk.msra.mxu1 %vm27_vm0, %v101_v63 }
 0x186   :  { %272 = vmatpush.msk.msra.mxu2 %vm27_vm0, %v102_v0  ;;  %274 = vmatpush.msk.msra.mxu3 %vm27_vm0, %v103_v2 }
 0x187   :  { %273 = vmatmul.msk.f32.vlgmr.msra.gmra.mxu2 %vm104_vm4, %v322_v1  ;;  %275 = vmatmul.msk.f32.vlgmr.msra.gmra.mxu3 %vm104_vm4, %v322_v1 }
 0x188   :  { %269 = vmatmul.msk.f32.vlgmr.msra.gmra.mxu0 %vm104_vm4, %v322_v1  ;;  %271 = vmatmul.msk.f32.vlgmr.msra.gmra.mxu1 %vm104_vm4, %v322_v1 }
 0x205   :  { %v136_v3 = vpop.f32.mrf.mxu0  ;;  %v156_v4 = vpop.f32.mrf.mxu1 }
 0x206   :  { %v204_v5 = vmul.f32 %v136_v3, %v136_v3  ;;  %v205_v6 = vmul.f32 %v156_v4, %v156_v4  ;;  %v199_v7 = vadd.f32 %v156_v4, %v136_v3 }
 0x208   :  { %v208_v8 = vadd.f32 %v205_v6, %v204_v5 }
 0x20a   :  { %v176_v9 = vpop.f32.mrf.mxu2  ;;  %v196_v10 = vpop.f32.mrf.mxu3 }
 0x20b   :  { %v200_v11 = vadd.f32 %v199_v7, %v176_v9  ;;  %v206_v12 = vmul.f32 %v176_v9, %v176_v9  ;;  %v207_v13 = vmul.f32 %v196_v10, %v196_v10 }
 0x20d   :  { %v201_v14 = vadd.f32 %v200_v11, %v196_v10  ;;  %v209_v15 = vadd.f32 %v208_v8, %v206_v12 }
 0x20f   :  { %202 = vadd.xlane.f32.xlu0 %v201_v14  ;;  %v210_v16 = vadd.f32 %v209_v15, %v207_v13 }
 0x211   :  { %211 = vadd.xlane.f32.xlu1 %v210_v16 }
 0x282   :  { %v203_v18 = vpop.xlane.xlu0 %202 }
 0x283   :  { %v213_v19 = vmul.f32 0.001953125, %v203_v18 }
 0x284   :  { %v212_v20 = vpop.xlane.xlu1 %211 }
 0x285   :  { %v215_v21 = vmul.f32 %v213_v19, %v213_v19  ;;  %v214_v22 = vmul.f32 0.001953125, %v212_v20 }
 0x287   :  { %v216_v23 = vsub.f32 %v214_v22, %v215_v21 }
 0x289   :  { %v217_v24 = vmax.f32 %v216_v23, 0.0 }
 0x28b   :  { %v218_v25 = vadd.f32 1e-05, %v217_v24 }
 0x28d   :  { %292 = vrsqrt.f32 %v218_v25  ;;  %vm225_vm6 = vweird.f32 %v218_v25 }
 0x293   :  { %v293_v26 = vpop.eup %292 }
 0x294   :  { %v220_v27 = vmul.f32 %v293_v26, %v218_v25  ;;  %vm226_vm5 = vweird.f32 %v293_v26 }
 0x295   :  { %vm227_vm7 = vmor %vm225_vm6, %vm226_vm5 }
 0x296   :  { %v221_v28 = vmul.f32 %v293_v26, %v220_v27 }
 0x298   :  { %v222_v29 = vmul.f32 0.5, %v221_v28 }
 0x29a   :  { %v223_v30 = vsub.f32 1.5, %v222_v29 }
 0x29c   :  { %v224_v31 = vmul.f32 %v293_v26, %v223_v30 }
 0x29e   :  { %v228_v32 = vsel %vm227_vm7, %v293_v26, %v224_v31 }
 0x29f   :  { %v229_v33 = vmul.f32 %v228_v32, %v322_v1 }
 0x2a1   :  { %238 = vperm.xlu0 %287, %v229_v33   ;;  %v230_v34 = vmul.f32 %v229_v33, %v213_v19 }
 0x2a3   :  { %232 = vrot.lane.b32.xlu2 %v230_v34, %s299_s1 }
 0x2a9   :  { %289 = vset.pattern.permute.xlu0 %v300_v35 }
 0x2fd   :  { %v233_v36 = vpop.permute.xlu2 %232 }
 0x2fe   :  { %v235_v37 = vsub.f32 %v322_v1, %v233_v36 }
 0x300   :  { %247 = vperm.xlu2 %288, %v235_v37  }
 0x313   :  { %v239_v38 = vpop.permute.xlu0 %238 }
 0x314   :  { %v241_v39 = vmul.f32 %v239_v38, %v136_v3  ;;  %v242_v40 = vmul.f32 %v239_v38, %v156_v4  ;;  %v243_v41 = vmul.f32 %v239_v38, %v176_v9  ;;  %v244_v42 = vmul.f32 %v239_v38, %v196_v10 }
 0x35a   :  { %v248_v43 = vpop.permute.xlu2 %247 }
 0x35b   :  { %v250_v44 = vadd.f32 %v248_v43, %v241_v39  ;;  %v251_v45 = vadd.f32 %v248_v43, %v242_v40  ;;  %v252_v46 = vadd.f32 %v248_v43, %v243_v41  ;;  %v253_v47 = vadd.f32 %v248_v43, %v244_v42 }
 0x35d   :  { %v254_v48 = vmax.f32 %v250_v44, 0.0  ;;  %v255_v49 = vmax.f32 %v251_v45, 0.0  ;;  %v256_v50 = vmax.f32 %v252_v46, 0.0  ;;  %v257_v51 = vmax.f32 %v253_v47, 0.0 }
 0x35f   :  { %258 = vst [vmem:[%s377_s2] sm:$0xff] %v254_v48 }
 0x360   :  { %259 = vst [vmem:[%s377_s2 + $0x8] sm:$0xff] %v255_v49 }
 0x361   :  { %276 = vst [vmem:[%s377_s2 + $0x10] sm:$0xff] %v256_v50 }
 0x362   :  { %277 = vst [vmem:[%s377_s2 + $0x18] sm:$0xff] %v257_v51 }

</bundles_post_ra>
